<compile_context>
chip_gen: v7x
topology: tpu7x:2x2x1
jax: 0.10.0
libtpu: 0.0.40
codegen_flags: <defaults>
</compile_context>

<pallas_src>
import jax
import jax.numpy as jnp
from jax import lax
from jax.experimental import pallas as pl
from jax.experimental.pallas import tpu as pltpu


# ---------------------------------------------------------------------------
# Kernel 1: global max pool over the spatial axis (HW), tiled & pipelined.
# ---------------------------------------------------------------------------
def _pool_kernel(x_ref, o_ref):
    # x_ref: (r_tile, hw_tile) current input block
    # o_ref: (r_tile, 1)       pooled output for this row tile (resident across hw axis)
    hi = pl.program_id(1)
    blk = jnp.max(x_ref[...], axis=-1, keepdims=True)  # per-block lane reduce (XLU)

    @pl.when(hi == 0)
    def _():
        o_ref[...] = blk

    @pl.when(hi > 0)
    def _():
        o_ref[...] = jnp.maximum(o_ref[...], blk)


# ---------------------------------------------------------------------------
# Kernel 2: fc1 (1x1 conv) -> ReLU -> fc2 (1x1 conv) -> sigmoid on pooled (B, C).
# ---------------------------------------------------------------------------
def _mlp_kernel(p_ref, w1_ref, w2_ref, o_ref):
    pooled = p_ref[...].astype(w1_ref.dtype)                      # (B, C)
    # h = pooled @ w1.T   (w1: (Cr, C)); keep weights in native dtype, f32 accumulate.
    h = lax.dot_general(pooled, w1_ref[...],
                        (((1,), (1,)), ((), ())),
                        preferred_element_type=jnp.float32)       # (B, Cr)
    h = jnp.maximum(h, 0.0)
    # y = h @ w2.T        (w2: (C, Cr))
    y = lax.dot_general(h.astype(w2_ref.dtype), w2_ref[...],
                        (((1,), (1,)), ((), ())),
                        preferred_element_type=jnp.float32)       # (B, C)
    o_ref[...] = jax.nn.sigmoid(y).astype(o_ref.dtype)


# ---------------------------------------------------------------------------
# Tiling helpers.
# ---------------------------------------------------------------------------
def _largest_aligned_divisor(n, align, limit):
    """Largest t dividing n with t % align == 0 and t <= limit, else None."""
    limit = min(n, limit)
    t = (limit // align) * align
    while t >= align:
        if n % t == 0:
            return t
        t -= align
    return None


def _sublane_align(dtype):
    """Sublane packing for the dtype: 8 for f32, 16 for bf16, 32 for int8/fp8."""
    return max(8, 32 // jnp.dtype(dtype).itemsize)


def _choose_tiles(R, HW, itemsize, align, block_budget):
    """Pick (r_tile, hw_tile) for x blocks of shape (r_tile, hw_tile) over (R, HW).

    Prefers full-HW rows (contiguous DMA) and tiles over rows.  The row tile is
    capped at <= R/2 so the parallel grid axis has >= 2 iterations (v7x megacore
    split; negligible cost on v5e/v6e).  Tiles satisfy the (sublane, 128) layout
    rule or equal the full dim.
    """
    hw_tile = HW
    row_bytes = max(1, HW * itemsize)
    r_limit = max(1, block_budget // row_bytes)
    if R >= 2 * align:
        r_limit = min(r_limit, R // 2)  # ensure >= 2 parallel iterations
    r_tile = _largest_aligned_divisor(R, align, r_limit)
    if r_tile is None:
        r_tile = R  # full dim is always a legal block shape

    if r_tile * hw_tile * itemsize > block_budget:
        hw_limit = max(512, block_budget // max(1, r_tile * itemsize))
        if HW > hw_limit:
            hw_tile = (_largest_aligned_divisor(HW, 512, hw_limit)
                       or _largest_aligned_divisor(HW, 128, hw_limit)
                       or HW)
    return r_tile, hw_tile


def _vmem_limit_bytes():
    """Generation-aware scoped-VMEM limit with headroom (48 MiB on 64 MiB parts,
    64 MiB on 128 MiB parts)."""
    cap = 128 * 1024 * 1024
    try:
        info = pltpu.get_tpu_info()
        cap = int(getattr(info, "vmem_capacity_bytes", cap)) or cap
    except Exception:
        pass
    return max(32 * 1024 * 1024, min(64 * 1024 * 1024, cap - 16 * 1024 * 1024))


# ---------------------------------------------------------------------------
# Wrapper.
# ---------------------------------------------------------------------------
def channel_attention(x_nchw, w1, w2, *, block_budget_bytes=8 * 1024 * 1024):
    """x_nchw: (B, C, H, W) float32/bf16.
    w1: (C//16, C)  -- Conv2d(C, C//16, 1, bias=False).weight squeezed.
    w2: (C, C//16)  -- Conv2d(C//16, C, 1, bias=False).weight squeezed.
    Returns (B, C, 1, 1) sigmoid attention weights (matches PyTorch forward).
    """
    B, C, H, W = x_nchw.shape
    Cr = w1.shape[0]
    HW = H * W
    R = B * C
    itemsize = jnp.dtype(x_nchw.dtype).itemsize
    align = _sublane_align(x_nchw.dtype)
    x_flat = x_nchw.reshape(R, HW)

    r_tile, hw_tile = _choose_tiles(R, HW, itemsize, align, block_budget_bytes)
    grid = (R // r_tile, HW // hw_tile)
    vmem_limit = _vmem_limit_bytes()

    pooled = pl.pallas_call(
        _pool_kernel,
        out_shape=jax.ShapeDtypeStruct((R, 1), x_nchw.dtype),
        grid_spec=pltpu.PrefetchScalarGridSpec(
            num_scalar_prefetch=0,
            grid=grid,
            in_specs=[pl.BlockSpec((r_tile, hw_tile), lambda ri, hi: (ri, hi))],
            out_specs=pl.BlockSpec((r_tile, 1), lambda ri, hi: (ri, 0)),
        ),
        compiler_params=pltpu.CompilerParams(
            dimension_semantics=("parallel", "arbitrary"),
            vmem_limit_bytes=vmem_limit,
        ),
        cost_estimate=pl.CostEstimate(
            flops=R * HW,
            transcendentals=0,
            bytes_accessed=R * HW * itemsize + R * itemsize,
        ),
    )(x_flat)

    pooled = pooled.reshape(B, C)

    # Tiny MLP: launch-overhead-bound, single block.  Kept separate because the
    # pooling parallel axis is split across cores (no single block holds all of B*C).
    attn = pl.pallas_call(
        _mlp_kernel,
        out_shape=jax.ShapeDtypeStruct((B, C), x_nchw.dtype),
        in_specs=[
            pl.BlockSpec((B, C), lambda: (0, 0)),
            pl.BlockSpec((Cr, C), lambda: (0, 0)),
            pl.BlockSpec((C, Cr), lambda: (0, 0)),
        ],
        out_specs=pl.BlockSpec((B, C), lambda: (0, 0)),
        compiler_params=pltpu.CompilerParams(
            vmem_limit_bytes=vmem_limit,
        ),
    )(pooled, w1, w2)

    return attn.reshape(B, C, 1, 1)


if __name__ == "__main__":
    key = jax.random.PRNGKey(0)
    kx, k1, k2 = jax.random.split(key, 3)

    B, C, H, W = 2, 32, 16, 16          # in_planes=32 -> hidden = 32 // 16 = 2
    Cr = C // 16

    x = jax.random.normal(kx, (B, C, H, W), dtype=jnp.float32)
    # Shapes from Conv2d(C, Cr, 1, bias=False) / Conv2d(Cr, C, 1, bias=False), squeezed.
    w1 = jax.random.normal(k1, (Cr, C), dtype=jnp.float32) * (1.0 / jnp.sqrt(C))
    w2 = jax.random.normal(k2, (C, Cr), dtype=jnp.float32) * (1.0 / jnp.sqrt(Cr))

    out = channel_attention(x, w1, w2)
    out = jax.block_until_ready(out)

    # Pure-JAX reference of the same semantics (max-pool branch only, as in the module).
    pooled_ref = jnp.max(x.reshape(B, C, H * W), axis=-1)
    h_ref = jnp.maximum(pooled_ref @ w1.T, 0.0)
    ref = jax.nn.sigmoid(h_ref @ w2.T).reshape(B, C, 1, 1)
    assert out.shape == (B, C, 1, 1)
    assert jnp.allclose(out, ref, atol=1e-5, rtol=1e-5)

    print("KERNEL_OK")
</pallas_src>

<mosaic_0001>
module attributes {stable_mosaic.version = 11 : i64} {
  func.func @_pool_kernel(%arg0: i32, %arg1: i32, %arg2: memref<32x256xf32, #tpu.memory_space<vmem>>, %arg3: memref<32x1xf32, #tpu.memory_space<vmem>>) attributes {dimension_semantics = [#tpu.dimension_semantics<parallel>, #tpu.dimension_semantics<arbitrary>], iteration_bounds = array<i64: 2, 1>, scalar_prefetch = 0 : i64, scratch_operands = 0 : i64, tpu.core_type = #tpu.core_type<tc>, window_params = [{transform_indices = @transform_0, window_bounds = array<i64: 32, 256>}, {transform_indices = @transform_1, window_bounds = array<i64: 32, 1>}]} {
    %c0 = arith.constant 0 : index
    %c0_0 = arith.constant 0 : index
    %0 = vector.load %arg2[%c0, %c0_0] : memref<32x256xf32, #tpu.memory_space<vmem>>, vector<32x256xf32>
    %cst = arith.constant dense<0xFF800000> : vector<32xf32>
    %1 = vector.multi_reduction <maximumf>, %0, %cst [1] : vector<32x256xf32> to vector<32xf32>
    %2 = vector.shape_cast %1 : vector<32xf32> to vector<32x1xf32>
    %c0_i32 = arith.constant 0 : i32
    %3 = arith.cmpi eq, %arg1, %c0_i32 : i32
    %4 = arith.extui %3 : i1 to i32
    %c0_i32_1 = arith.constant 0 : i32
    %5 = arith.cmpi ne, %4, %c0_i32_1 : i32
    scf.if %5 {
      %c0_4 = arith.constant 0 : index
      %c0_5 = arith.constant 0 : index
      %9 = vector.load %arg3[%c0_4, %c0_5] : memref<32x1xf32, #tpu.memory_space<vmem>>, vector<32x1xf32>
      tpu.vector_store %arg3[%c0_4, %c0_5], %2 {strides = array<i32>} : memref<32x1xf32, #tpu.memory_space<vmem>>, vector<32x1xf32>,
    } else {
    }
    %c0_i32_2 = arith.constant 0 : i32
    %6 = arith.cmpi sgt, %arg1, %c0_i32_2 : i32
    %7 = arith.extui %6 : i1 to i32
    %c0_i32_3 = arith.constant 0 : i32
    %8 = arith.cmpi ne, %7, %c0_i32_3 : i32
    scf.if %8 {
      %c0_4 = arith.constant 0 : index
      %c0_5 = arith.constant 0 : index
      %9 = vector.load %arg3[%c0_4, %c0_5] : memref<32x1xf32, #tpu.memory_space<vmem>>, vector<32x1xf32>
      %10 = arith.maximumf %9, %2 : vector<32x1xf32>
      %c0_6 = arith.constant 0 : index
      %c0_7 = arith.constant 0 : index
      %11 = vector.load %arg3[%c0_6, %c0_7] : memref<32x1xf32, #tpu.memory_space<vmem>>, vector<32x1xf32>
      tpu.vector_store %arg3[%c0_6, %c0_7], %10 {strides = array<i32>} : memref<32x1xf32, #tpu.memory_space<vmem>>, vector<32x1xf32>,
    } else {
    }
    return
  }
  func.func @transform_0(%arg0: i32, %arg1: i32) -> (i32, i32) {
    %c0_i32 = arith.constant 0 : i32
    return %arg0, %arg1 : i32, i32
  }
  func.func @transform_1(%arg0: i32, %arg1: i32) -> (i32, i32) {
    %c0_i32 = arith.constant 0 : i32
    %c0_i32_0 = arith.constant 0 : i32
    return %arg0, %c0_i32 : i32, i32
  }
}

</mosaic_0001>

<bundles_post_ra>
// kernel: tpu_custom_call.1
= control target key start
LH: loop header
LB: loop body
LE: loop exit
PB: predicated region body
PF: predicated region fallthrough
CT: control target
= control target key end

     0   :  { %6 = vsyncpa [#allocation3], 0  ;;  %s690_s0 = inlined_call_operand.hbm [shape: f32[64,256], index: 0, kind: input, shape index: {}]   ;;  %s691_s1 = inlined_call_operand.hbm [shape: f32[64,1], index: 1, kind: output, shape index: {}]  }
   0x1   :  { %8 = vsyncpa [#allocation3 + $0x1], 0 }
   0x2   :  { %9 = vsyncpa [#allocation4], 0 }
   0x3   :  { %11 = vsyncpa [#allocation4 + $0x1], 0  ;;  %s514_s6 = smov 0   ;;  %s516_s7 = smov 0  }
   0x4   :  { %s518_s8 = smov 0   ;;  %s520_s9 = smov 0  }
   0x5   :  { %s522_s10 = smov 0   ;;  %s524_s11 = smov 0  }
   0x6 LB: > { %s299_s12 = sadd.s32 4294967295, %s496_s11   ;;  %s300_s13 = sadd.s32 4294967294, %s496_s11   ;;  %s496_s11 = sphi %s524_s11, %s17_s11   ;;  %s492_s10 = sphi %s522_s10, %s706_s10   ;;  %s488_s9 = sphi %s520_s9, %s705_s9   ;;  %s484_s8 = sphi %s518_s8, %s704_s8   ;;  %s480_s7 = sphi %s516_s7, %s703_s7   ;;  %s476_s6 = sphi %s514_s6, %s702_s6  }
   0x7   : > { %s29_s14 = sadd.s32 1, %s492_s10  ;;  %s38_s15 = sadd.s32 1, %s484_s8 }
   0x8   : > { %p31_p0 = scmp.ge.s32.totalorder %s29_s14, 2  ;;  %p45_p1 = scmp.ne.s32.totalorder %s484_s8, %s480_s7 }
   0x9   : > { %p46_p2 = scmp.eq.s32.totalorder %s496_s11, 0  ;;  %p51_p3 = scmp.ne.s32.totalorder %s480_s7, %s476_s6 }
   0xa   : > { %s708_s14 = smov (%p31_p0, %s29_s14), 0  ;;  %p52_p5 = scmp.eq.s32.totalorder %s299_s12, 0 }
   0xb   : > { %p555_p4 = por %p46_p2, %p45_p1  ;;  %s33_s17 = ssub.s32 %s492_s10, %s708_s14 }
   0xc   : > { %p75_p6 = scmp.eq.s32.totalorder %s299_s12, 1  ;;  %p36_p7 = scmp.eq.s32.totalorder %s33_s17, 0 }
   0xd   : > { %p561_p8 = por %p52_p5, %p51_p3  ;;  %p81_p10 = scmp.eq.s32.totalorder %s300_s13, 1 }
   0xe   : > { %p565_p9 = por %p75_p6, %p45_p1  ;;  %p330_p13 = scmp.lt.s32.totalorder %s496_s11, 2 }
   0xf   : > { %s570_s20 = scalar_select %p36_p7, %s484_s8, %s38_s15  }
  0x10   : > { %s695_s19 = scalar_select %p565_p9, 1, 0 }
  0x11   : > { %p572_p11 = por %p81_p10, %p51_p3  ;;  %s101_s22 = sand.u32 1, %s484_s8  }
  0x12   : > { %s303_s23 = sshll.u32 %s101_s22, 6  ;;  %s316_s24 = sshll.u32 %s492_s10, 10 }
  0x13   : > { %s696_s21 = scalar_select %p572_p11, 1, 0 }
  0x14   : > { %s583_s27 = scalar_lea.hbm %s690_s0, %s316_s24  ;;  %s105_s28 = scalar_lea.vmem [#allocation2], %s303_s23 }
  0x15   : > { %s115_s29 = sshll.u32 %s105_s28, 4  ;;  %p589_p0 = pnand %p330_p13, %p555_p4  ;;  %s585_s29 = int_to_ptr.vmem [resolvable:$true] %s115_s29 }
  0x16   : > { %s594_s2 = scalar_lea.sflag [#allocation3], %s101_s22  ;;  %s384_s3 = scalar_lea.hbm %s583_s27, 1024 }
  0x17   : > { %p385_p2 = scmp.ne.s32.totalorder %s583_s27, %s384_s3  ;;  %p386_p3 = pneg %p589_p0 }
  0x18   : > { %s389_s12 = scalar_lea.hbm %s690_s0, 2048  ;;  %p390_p4 = scmp.lt.u32.totalorder %s583_s27, %s690_s0 }
  0x19   : > { %p387_p5 = pnand %p386_p3, %p385_p2  ;;  %p391_p7 = scmp.lt.u32.totalorder %s389_s12, %s384_s3 }
  0x1a   : > { %p393_p13 = scmp.lt.u32.totalorder %s384_s3, %s583_s27 }
  0x1b   : > { %p388_p6 = pneg %p387_p5  ;;  %p392_p10 = por %p391_p7, %p390_p4 }
  0x1d   : > { %p394_p12 = por %p393_p13, %p392_p10 }
  0x1f   : > { %p395_p1 = pnand %p394_p12, %p388_p6 }
  0x21   : > { %398 = shalt.err (!%p395_p1)
}
  0x22   : > { %s399_s16 = scalar_lea.vmem %s585_s29, 1024  ;;  %s498_s17 = smov [#allocation2]  }
  0x23   : > { %p400_p2 = scmp.ne.s32.totalorder %s585_s29, %s399_s16  ;;  %s404_s22 = sshll.u32 %s498_s17, 4  ;;  %s405_s22 = int_to_ptr.vmem [resolvable:$false] %s404_s22 }
  0x24   : > { %s406_s23 = scalar_lea.vmem %s405_s22, 2048  ;;  %p407_p9 = scmp.lt.s32.totalorder %s585_s29, %s405_s22 }
  0x25   : > { %p402_p5 = pnand %p400_p2, %p386_p3  ;;  %p408_p4 = scmp.lt.s32.totalorder %s406_s23, %s399_s16 }
  0x27   : > { %p403_p11 = pneg %p402_p5  ;;  %p409_p7 = por %p408_p4, %p407_p9 }
  0x29   : > { %p410_p10 = pnand %p409_p7, %p403_p11 }
  0x2b   : > { %413 = shalt.err (!%p410_p10)
}
  0x2c   : > { %s499_s24 = smov 256   ;;  %s500_s25 = smov 16  }
  0x2d   : > { %325 = dma.hbm_to_vmem [thread:$0]  (!%p589_p0), %s583_s27, 1024, %s585_s29, %s594_s2, %s499_s24, %s499_s24, %s500_s25  }
  0x2e   : > { %p123_p12 = scmp.lt.s32.totalorder %s496_s11, 3  ;;  %p698_p1 = scmp.ge.s32.totalorder %s496_s11, 1 }
  0x30   : > { %p124_p3 = pnand %p698_p1, %p123_p12 }
  0x31   : > { %s626_s26 = sand.u32 (!%p124_p3), 1, %s480_s7  }
  0x32   : > { %127 = sbr.rel (%p124_p3) target bundleno = 223 (0xdf), region = 24  ;;  %s308_s28 = sshll.u32 (!%p124_p3), %s626_s26, 6 }
  0x33   : > { %s130_s3 = scalar_lea.sflag (!%p124_p3), [#allocation3], %s626_s26  ;;  %s133_s4 = scalar_lea.vmem (!%p124_p3), [#allocation2], %s308_s28 }
  0x39   : > { %467 = dma.done.wait (%p561_p8), %s130_s3, 1024  }
  0x3a   : > { %469 = vsyncadd (%p561_p8), %s130_s3, 4294966272  ;;  %v159_v0 = vld [vmem:[%s133_s4 + $0x20] sm:$0xff]  ;;  %v160_v1 = vld [vmem:[%s133_s4 + $0x28] sm:$0xff]  ;;  %s309_s18 = sshll.u32 %s626_s26, 5  ;;  %vm179_vm0 = vcmask 7168   ;;  %s317_s30 = sshll.u32 %s488_s9, 9 }
  0x3b   : > { %v155_v2 = vld [vmem:[%s133_s4] sm:$0xff]  ;;  %v169_v3 = vmax.f32 %v159_v0, %v160_v1  ;;  %v156_v4 = vld [vmem:[%s133_s4 + $0x8] sm:$0xff]  ;;  %v161_v5 = vld [vmem:[%s133_s4 + $0x30] sm:$0xff]  ;;  %s151_s27 = scalar_lea.vmem [#allocation5], %s309_s18  ;;  %s641_s12 = scalar_lea.hbm %s691_s1, %s317_s30 }
  0x3c   : > { %v162_v6 = vld [vmem:[%s133_s4 + $0x38] sm:$0xff]  ;;  %v163_v7 = vmax.f32 %v155_v2, %v156_v4  ;;  %v157_v8 = vld [vmem:[%s133_s4 + $0x10] sm:$0xff]  ;;  %s215_s29 = sshll.u32 %s151_s27, 4  ;;  %s202_s13 = scalar_lea.sflag [#allocation4], %s626_s26  ;;  %s636_s29 = int_to_ptr.vmem [resolvable:$true] %s215_s29 }
  0x3d   : > { %v158_v9 = vld [vmem:[%s133_s4 + $0x18] sm:$0xff]  ;;  %170 = vmax.xlane.f32.xlu1 %v169_v3  ;;  %v172_v10 = vmax.f32 %v161_v5, %v162_v6  ;;  %s414_s15 = scalar_lea.vmem %s636_s29, 512  ;;  %p699_p9 = scmp.ne.s32.totalorder %s695_s19, 0 }
  0x3e   : > { %164 = vmax.xlane.f32.xlu0 %v163_v7  ;;  %v166_v11 = vmax.f32 %v157_v8, %v158_v9  ;;  %p415_p8 = scmp.ne.s32.totalorder %s636_s29, %s414_s15  ;;  %s501_s9 = smov [#allocation5]  }
  0x3f   : > { %s418_s16 = sshll.u32 %s501_s9, 4  ;;  %s419_s16 = int_to_ptr.vmem [resolvable:$false] %s418_s16 }
  0x40   : > { %p416_p11 = pnand %p415_p8, %p699_p9  ;;  %s420_s17 = scalar_lea.vmem %s419_s16, 1024 }
  0x41   : > { %173 = vmax.xlane.f32.xlu1 %v172_v10  ;;  %p421_p6 = scmp.lt.s32.totalorder %s636_s29, %s419_s16  ;;  %p422_p13 = scmp.lt.s32.totalorder %s420_s17, %s414_s15 }
  0x42   : > { %167 = vmax.xlane.f32.xlu0 %v166_v11  ;;  %p417_p0 = pneg %p416_p11 }
  0x43   : > { %p423_p2 = por %p422_p13, %p421_p6 }
  0x45   : > { %p424_p5 = pnand %p423_p2, %p417_p0 }
  0xca   : > { %v171_v12 = vpop.xlane.xlu1 %170 }
  0xcb   : > { %182 = vst.msk [vmem:[%s151_s27 + $0x10] sm:$0xff] %vm179_vm0, %v171_v12  ;;  %v165_v13 = vpop.xlane.xlu0 %164 }
  0xcc   : > { %180 = vst.msk [vmem:[%s151_s27] sm:$0xff] %vm179_vm0, %v165_v13 }
  0xce   : > { %v174_v14 = vpop.xlane.xlu1 %173 }
  0xcf   : > { %183 = vst.msk [vmem:[%s151_s27 + $0x18] sm:$0xff] %vm179_vm0, %v174_v14  ;;  %v168_v15 = vpop.xlane.xlu0 %167 }
  0xd0   : > { %181 = vst.msk [vmem:[%s151_s27 + $0x8] sm:$0xff] %vm179_vm0, %v168_v15 }
  0xd1   : > { %427 = shalt.err (!%p424_p5)
}
  0xd2   : > { %s428_s22 = scalar_lea.hbm %s641_s12, 512  ;;  %s432_s25 = scalar_lea.hbm %s691_s1, 1024 }
  0xd3   : > { %p429_p4 = scmp.ne.s32.totalorder %s641_s12, %s428_s22  ;;  %p433_p12 = scmp.lt.u32.totalorder %s641_s12, %s691_s1 }
  0xd4   : > { %p434_p1 = scmp.lt.u32.totalorder %s432_s25, %s428_s22  ;;  %p436_p8 = scmp.lt.u32.totalorder %s428_s22, %s641_s12 }
  0xd5   : > { %p430_p7 = pnand %p429_p4, %p699_p9 }
  0xd6   : > { %p435_p3 = por %p434_p1, %p433_p12 }
  0xd7   : > { %p431_p10 = pneg %p430_p7 }
  0xd8   : > { %p437_p11 = por %p436_p8, %p435_p3 }
  0xda   : > { %p438_p0 = pnand %p437_p11, %p431_p10 }
  0xdc   : > { %441 = shalt.err (!%p438_p0)
}
  0xdd   : > { %s502_s4 = smov 128   ;;  %s503_s18 = smov 8  }
  0xde   : > { %320 = dma.vmem_to_hbm [thread:$0]  (%p699_p9), %s636_s29, 512, %s641_s12, %s202_s13, %s502_s4, %s502_s4, %s503_s18  }
  0xdf PF: > { %s230_s27 = sand.u32 1, %s476_s6   ;;  %p700_p6 = scmp.ne.s32.totalorder %s696_s21, 0 }
  0xe0   : > { %p701_p13 = scmp.ge.s32.totalorder %s496_s11, 2  ;;  %s231_s30 = scalar_lea.sflag [#allocation4], %s230_s27 }
  0xe2   : > { %p327_p2 = pnand %p701_p13, %p700_p6 }
  0xe4   : > { %471 = dma.done.wait (!%p327_p2), %s231_s30, 512  }
  0xe5   : > { %473 = vsyncadd (!%p327_p2), %s231_s30, 4294966784  ;;  %s17_s11 = sadd.s32 1, %s496_s11   ;;  %s702_s6 = smov %s480_s7 }
  0xe6   : > { %p14_p5 = scmp.ge.s32.totalorder %s17_s11, 4   ;;  %s703_s7 = smov %s484_s8 }
  0xe7   : > { %s704_s8 = smov %s570_s20  ;;  %s705_s9 = smov %s492_s10 }
  0xe8   : > { %s706_s10 = smov %s708_s14  ;;  %16 = sbr.rel (!%p14_p5) target bundleno = 6 (0x6), region = 77 }
  0xef   :  { %236 = vsyncpa [#allocation3], 1 }
  0xf0   :  { %238 = vsyncpa [#allocation3 + $0x1], 1 }
  0xf1   :  { %239 = vsyncpa [#allocation4], 1 }
  0xf2   :  { %241 = vsyncpa [#allocation4 + $0x1], 1 }

</bundles_post_ra>
